<compile_context>
chip_gen: v5e
topology: v5e:2x2
jax: 0.10.0
libtpu: 0.0.40
codegen_flags: <defaults>
</compile_context>

<pallas_src>
import jax
import jax.numpy as jnp
from jax import lax
from jax.experimental import pallas as pl
from jax.experimental.pallas import tpu as pltpu


def graph_conv_kernel(x_ref, a_ref, w_ref, b_ref, o_ref):
    # x_ref: (TB, F, N) f32, a_ref: (TB, N, N) bf16/f32, w_ref: (F, F) f32,
    # b_ref: (F, 1) f32, o_ref: (TB, F, N)
    tb, f, n = x_ref.shape
    w = w_ref[...].astype(jnp.float32)
    # Hoisted once per grid step; the unrolled loop reuses the already-broadcast tile.
    bias_fn = jnp.broadcast_to(b_ref[...].astype(jnp.float32), (f, n))

    def body(b, carry):
        xf = x_ref[b].astype(jnp.float32)                          # (F, N)
        # A may be stored bf16 in HBM; upcast in VMEM so accumulation stays f32
        # (HBM traffic is already halved, the VPU upcast is free vs. the DMA).
        af = a_ref[b].astype(jnp.float32)                          # (N, N)
        # Associativity: (W @ X) @ A == W @ (X @ A).
        xw = jnp.dot(w, xf, preferred_element_type=jnp.float32)    # (F, N)
        y = jnp.dot(xw, af, preferred_element_type=jnp.float32)    # (F, N)
        o_ref[b] = (y + bias_fn + xf).astype(o_ref.dtype)          # conv bias + residual
        return carry

    # Bounded live ranges + full LLO visibility (review item: don't use a Python for).
    lax.fori_loop(0, tb, body, None, unroll=True)


def _tpu_hw_info():
    """Best-effort (num TensorCores per chip, physical VMEM bytes); conservative defaults."""
    kind = ""
    try:
        kind = jax.devices()[0].device_kind.lower()
    except Exception:
        pass
    is_v7 = "v7" in kind
    num_tcs = 2 if is_v7 else 1                 # v7x: 2 TCs share one chip
    vmem = (64 if is_v7 else 128) * (2 ** 20)   # v7x: 64 MiB/TC, v5e/v6e: 128 MiB
    try:
        vmem = int(getattr(pltpu.get_tpu_info(), "vmem_capacity_bytes", vmem))
    except Exception:
        pass
    return num_tcs, vmem


def _step_vmem_bytes(tb, F, N, x_itemsize, a_itemsize):
    a_blk = tb * N * N * a_itemsize
    xo_blk = tb * F * N * x_itemsize
    # inputs + output are double-buffered by the BlockSpec pipeline; W/bias are resident.
    return 2 * (a_blk + 2 * xo_blk) + F * F * 4 + F * 128 * 4


def _pick_block_b(B, F, N, x_itemsize, a_itemsize, num_tcs, vmem_cap,
                  target_a_bytes=1 << 20, max_tb=64):
    """Bandwidth-driven batch-block selection (per perf review)."""
    budget = int(0.6 * vmem_cap)   # leave headroom for compiler scratch
    candidates = sorted((tb for tb in range(1, min(B, max_tb) + 1) if B % tb == 0),
                        reverse=True)
    feasible = []
    for tb in candidates:
        if num_tcs > 1 and B >= num_tcs and (B // tb) < num_tcs:
            continue   # only on multi-TC chips: keep >= num_tcs "parallel" grid steps
        if _step_vmem_bytes(tb, F, N, x_itemsize, a_itemsize) > budget:
            continue
        feasible.append(tb)
    if not feasible:
        return 1
    # Smallest TB whose per-step A DMA already reaches ~1 MiB; else the largest feasible.
    reaching = [tb for tb in feasible if tb * N * N * a_itemsize >= target_a_bytes]
    return min(reaching) if reaching else max(feasible)


def graph_convolution(X, A, W, bias, *, block_b=None, a_dtype=jnp.bfloat16):
    """X: (B, F, N), A: (B, N, N), W: (F, F), bias: (F,) -> (B, F, N, 1, 1).

    a_dtype: HBM storage dtype for A (default bf16 -> halves the dominant HBM traffic;
    accumulation stays f32).  Pass a_dtype=None to keep A at its original precision.
    """
    B, F, N = X.shape
    assert A.shape == (B, N, N) and W.shape == (F, F) and bias.shape == (F,)

    if a_dtype is not None and A.dtype != a_dtype:
        A = A.astype(a_dtype)
    W = W.astype(jnp.float32)
    bias2d = bias.reshape(F, 1).astype(jnp.float32)

    num_tcs, vmem_cap = _tpu_hw_info()
    x_isz, a_isz = X.dtype.itemsize, A.dtype.itemsize
    if block_b is None:
        block_b = _pick_block_b(B, F, N, x_isz, a_isz, num_tcs, vmem_cap)
    assert B % block_b == 0
    nb = B // block_b

    needed = _step_vmem_bytes(block_b, F, N, x_isz, a_isz)
    vmem_limit = int(min(int(0.85 * vmem_cap), max(2 * needed, 24 * (2 ** 20))))
    vmem_limit = max(vmem_limit, needed + (1 << 20))

    cost = pl.CostEstimate(
        flops=2 * B * F * N * N + 2 * B * F * F * N,
        transcendentals=0,
        bytes_accessed=(2 * B * F * N) * x_isz       # X in, out
        + (B * N * N) * a_isz                        # A in (bf16 by default)
        + (F * F + F) * 4,                           # weights + bias
    )

    out = pl.pallas_call(
        graph_conv_kernel,
        out_shape=jax.ShapeDtypeStruct((B, F, N), X.dtype),
        grid_spec=pltpu.PrefetchScalarGridSpec(
            num_scalar_prefetch=0,
            grid=(nb,),
            in_specs=[
                pl.BlockSpec((block_b, F, N), lambda i: (i, 0, 0)),
                pl.BlockSpec((block_b, N, N), lambda i: (i, 0, 0)),
                pl.BlockSpec((F, F), lambda i: (0, 0)),
                pl.BlockSpec((F, 1), lambda i: (0, 0)),
            ],
            out_specs=pl.BlockSpec((block_b, F, N), lambda i: (i, 0, 0)),
        ),
        compiler_params=pltpu.CompilerParams(
            dimension_semantics=("parallel",),
            vmem_limit_bytes=vmem_limit,
        ),
        cost_estimate=cost,
    )(X, A, W, bias2d)

    # match PyTorch output shape (B, F, N, 1, 1)
    return out.reshape(B, F, N, 1, 1)


def graph_convolution_ref(X, A, W, bias, *, a_dtype=jnp.bfloat16):
    """Pure-JAX reference. With a_dtype matching the kernel it isolates kernel error;
    with a_dtype=None it is the exact f32 PyTorch semantics."""
    if a_dtype is not None:
        A = A.astype(a_dtype)
    A = A.astype(jnp.float32)
    hp = jax.lax.Precision.HIGHEST
    xa = jnp.einsum("bfn,bnm->bfm", X, A, precision=hp)
    y = jnp.einsum("of,bfn->bon", W, xa, precision=hp) + bias[None, :, None] + X
    return y.reshape(*y.shape, 1, 1)


if __name__ == "__main__":
    key = jax.random.PRNGKey(0)
    B, F, N = 8, 8, 128

    k1, k2, k3, k4 = jax.random.split(key, 4)
    X = jax.random.normal(k1, (B, F, N), dtype=jnp.float32)
    A = jax.random.normal(k2, (B, N, N), dtype=jnp.float32)
    # Conv3d(F, F, kernel_size=(1,1,1)) params: weight (F, F, 1, 1, 1) -> (F, F), bias (F,)
    W = jax.random.normal(k3, (F, F), dtype=jnp.float32) * 0.1
    bias = jax.random.normal(k4, (F,), dtype=jnp.float32) * 0.1

    out = jax.block_until_ready(graph_convolution(X, A, W, bias))
    assert out.shape == (B, F, N, 1, 1)

    # Tight check vs a reference using the same bf16-A storage (isolates kernel error).
    ref_matched = graph_convolution_ref(X, A, W, bias)
    assert jnp.allclose(out, ref_matched, atol=1e-4, rtol=1e-4), "mismatch vs matched-precision reference"

    # Loose sanity check vs the exact f32 PyTorch semantics (difference = bf16-A quantization).
    ref_f32 = graph_convolution_ref(X, A, W, bias, a_dtype=None)
    assert jnp.allclose(out, ref_f32, atol=0.25, rtol=0.05), "mismatch vs f32 reference"

    print("KERNEL_OK")
</pallas_src>

<mosaic_0001>
module attributes {stable_mosaic.version = 11 : i64} {
  func.func @graph_conv_kernel(%arg0: i32, %arg1: memref<8x8x128xf32, #tpu.memory_space<vmem>>, %arg2: memref<8x128x128xbf16, #tpu.memory_space<vmem>>, %arg3: memref<8x8xf32, #tpu.memory_space<vmem>>, %arg4: memref<8x1xf32, #tpu.memory_space<vmem>>, %arg5: memref<8x8x128xf32, #tpu.memory_space<vmem>>) attributes {dimension_semantics = [#tpu.dimension_semantics<parallel>], iteration_bounds = array<i64: 1>, scalar_prefetch = 0 : i64, scratch_operands = 0 : i64, tpu.core_type = #tpu.core_type<tc>, window_params = [{transform_indices = @transform_0, window_bounds = array<i64: 8, 8, 128>}, {transform_indices = @transform_1, window_bounds = array<i64: 8, 128, 128>}, {pipeline_mode = #tpu.pipeline_mode<synchronous>, transform_indices = @transform_2, window_bounds = array<i64: 8, 8>}, {pipeline_mode = #tpu.pipeline_mode<synchronous>, transform_indices = @transform_3, window_bounds = array<i64: 8, 1>}, {transform_indices = @transform_4, window_bounds = array<i64: 8, 8, 128>}]} {
    %c0 = arith.constant 0 : index
    %c0_0 = arith.constant 0 : index
    %0 = vector.load %arg3[%c0, %c0_0] : memref<8x8xf32, #tpu.memory_space<vmem>>, vector<8x8xf32>
    %c0_1 = arith.constant 0 : index
    %c0_2 = arith.constant 0 : index
    %1 = vector.load %arg4[%c0_1, %c0_2] : memref<8x1xf32, #tpu.memory_space<vmem>>, vector<8x1xf32>
    %2 = vector.shape_cast %1 : vector<8x1xf32> to vector<8x1xf32>
    %3 = vector.broadcast %2 : vector<8x1xf32> to vector<8x128xf32>
    %c0_i32 = arith.constant 0 : i32
    %4 = arith.index_cast %c0_i32 : i32 to index
    %c0_3 = arith.constant 0 : index
    %c0_4 = arith.constant 0 : index
    %5 = vector.load %arg1[%4, %c0_3, %c0_4] : memref<8x8x128xf32, #tpu.memory_space<vmem>>, vector<1x8x128xf32>
    %6 = vector.shape_cast %5 : vector<1x8x128xf32> to vector<8x128xf32>
    %7 = arith.index_cast %c0_i32 : i32 to index
    %c0_5 = arith.constant 0 : index
    %c0_6 = arith.constant 0 : index
    %8 = vector.load %arg2[%7, %c0_5, %c0_6] : memref<8x128x128xbf16, #tpu.memory_space<vmem>>, vector<1x128x128xbf16>
    %9 = vector.shape_cast %8 : vector<1x128x128xbf16> to vector<128x128xbf16>
    %10 = arith.extf %9 : vector<128x128xbf16> to vector<128x128xf32>
    %cst = arith.constant dense<0.000000e+00> : vector<8x128xf32>
    %11 = tpu.matmul %0, %6, %cst {dimension_numbers = #tpu.dot_dimension_numbers<[1], [0], [0], [1], [0, 0, 1, 1], [], []>} : vector<8x8xf32>, vector<8x128xf32>, vector<8x128xf32> -> vector<8x128xf32>
    %cst_7 = arith.constant dense<0.000000e+00> : vector<8x128xf32>
    %12 = tpu.matmul %11, %10, %cst_7 {dimension_numbers = #tpu.dot_dimension_numbers<[1], [0], [0], [1], [0, 0, 1, 1], [], []>} : vector<8x128xf32>, vector<128x128xf32>, vector<8x128xf32> -> vector<8x128xf32>
    %13 = arith.addf %12, %3 : vector<8x128xf32>
    %14 = arith.addf %13, %6 : vector<8x128xf32>
    %15 = arith.index_cast %c0_i32 : i32 to index
    %c0_8 = arith.constant 0 : index
    %c0_9 = arith.constant 0 : index
    %16 = vector.load %arg5[%15, %c0_8, %c0_9] : memref<8x8x128xf32, #tpu.memory_space<vmem>>, vector<1x8x128xf32>
    %17 = vector.shape_cast %16 : vector<1x8x128xf32> to vector<8x128xf32>
    %18 = vector.shape_cast %14 : vector<8x128xf32> to vector<1x8x128xf32>
    tpu.vector_store %arg5[%15, %c0_8, %c0_9], %18 {strides = array<i32>} : memref<8x8x128xf32, #tpu.memory_space<vmem>>, vector<1x8x128xf32>,
    %c1_i32 = arith.constant 1 : i32
    %19 = arith.index_cast %c1_i32 : i32 to index
    %c0_10 = arith.constant 0 : index
    %c0_11 = arith.constant 0 : index
    %20 = vector.load %arg1[%19, %c0_10, %c0_11] : memref<8x8x128xf32, #tpu.memory_space<vmem>>, vector<1x8x128xf32>
    %21 = vector.shape_cast %20 : vector<1x8x128xf32> to vector<8x128xf32>
    %22 = arith.index_cast %c1_i32 : i32 to index
    %c0_12 = arith.constant 0 : index
    %c0_13 = arith.constant 0 : index
    %23 = vector.load %arg2[%22, %c0_12, %c0_13] : memref<8x128x128xbf16, #tpu.memory_space<vmem>>, vector<1x128x128xbf16>
    %24 = vector.shape_cast %23 : vector<1x128x128xbf16> to vector<128x128xbf16>
    %25 = arith.extf %24 : vector<128x128xbf16> to vector<128x128xf32>
    %cst_14 = arith.constant dense<0.000000e+00> : vector<8x128xf32>
    %26 = tpu.matmul %0, %21, %cst_14 {dimension_numbers = #tpu.dot_dimension_numbers<[1], [0], [0], [1], [0, 0, 1, 1], [], []>} : vector<8x8xf32>, vector<8x128xf32>, vector<8x128xf32> -> vector<8x128xf32>
    %cst_15 = arith.constant dense<0.000000e+00> : vector<8x128xf32>
    %27 = tpu.matmul %26, %25, %cst_15 {dimension_numbers = #tpu.dot_dimension_numbers<[1], [0], [0], [1], [0, 0, 1, 1], [], []>} : vector<8x128xf32>, vector<128x128xf32>, vector<8x128xf32> -> vector<8x128xf32>
    %28 = arith.addf %27, %3 : vector<8x128xf32>
    %29 = arith.addf %28, %21 : vector<8x128xf32>
    %30 = arith.index_cast %c1_i32 : i32 to index
    %c0_16 = arith.constant 0 : index
    %c0_17 = arith.constant 0 : index
    %31 = vector.load %arg5[%30, %c0_16, %c0_17] : memref<8x8x128xf32, #tpu.memory_space<vmem>>, vector<1x8x128xf32>
    %32 = vector.shape_cast %31 : vector<1x8x128xf32> to vector<8x128xf32>
    %33 = vector.shape_cast %29 : vector<8x128xf32> to vector<1x8x128xf32>
    tpu.vector_store %arg5[%30, %c0_16, %c0_17], %33 {strides = array<i32>} : memref<8x8x128xf32, #tpu.memory_space<vmem>>, vector<1x8x128xf32>,
    %c2_i32 = arith.constant 2 : i32
    %34 = arith.index_cast %c2_i32 : i32 to index
    %c0_18 = arith.constant 0 : index
    %c0_19 = arith.constant 0 : index
    %35 = vector.load %arg1[%34, %c0_18, %c0_19] : memref<8x8x128xf32, #tpu.memory_space<vmem>>, vector<1x8x128xf32>
    %36 = vector.shape_cast %35 : vector<1x8x128xf32> to vector<8x128xf32>
    %37 = arith.index_cast %c2_i32 : i32 to index
    %c0_20 = arith.constant 0 : index
    %c0_21 = arith.constant 0 : index
    %38 = vector.load %arg2[%37, %c0_20, %c0_21] : memref<8x128x128xbf16, #tpu.memory_space<vmem>>, vector<1x128x128xbf16>
    %39 = vector.shape_cast %38 : vector<1x128x128xbf16> to vector<128x128xbf16>
    %40 = arith.extf %39 : vector<128x128xbf16> to vector<128x128xf32>
    %cst_22 = arith.constant dense<0.000000e+00> : vector<8x128xf32>
    %41 = tpu.matmul %0, %36, %cst_22 {dimension_numbers = #tpu.dot_dimension_numbers<[1], [0], [0], [1], [0, 0, 1, 1], [], []>} : vector<8x8xf32>, vector<8x128xf32>, vector<8x128xf32> -> vector<8x128xf32>
    %cst_23 = arith.constant dense<0.000000e+00> : vector<8x128xf32>
    %42 = tpu.matmul %41, %40, %cst_23 {dimension_numbers = #tpu.dot_dimension_numbers<[1], [0], [0], [1], [0, 0, 1, 1], [], []>} : vector<8x128xf32>, vector<128x128xf32>, vector<8x128xf32> -> vector<8x128xf32>
    %43 = arith.addf %42, %3 : vector<8x128xf32>
    %44 = arith.addf %43, %36 : vector<8x128xf32>
    %45 = arith.index_cast %c2_i32 : i32 to index
    %c0_24 = arith.constant 0 : index
    %c0_25 = arith.constant 0 : index
    %46 = vector.load %arg5[%45, %c0_24, %c0_25] : memref<8x8x128xf32, #tpu.memory_space<vmem>>, vector<1x8x128xf32>
    %47 = vector.shape_cast %46 : vector<1x8x128xf32> to vector<8x128xf32>
    %48 = vector.shape_cast %44 : vector<8x128xf32> to vector<1x8x128xf32>
    tpu.vector_store %arg5[%45, %c0_24, %c0_25], %48 {strides = array<i32>} : memref<8x8x128xf32, #tpu.memory_space<vmem>>, vector<1x8x128xf32>,
    %c3_i32 = arith.constant 3 : i32
    %49 = arith.index_cast %c3_i32 : i32 to index
    %c0_26 = arith.constant 0 : index
    %c0_27 = arith.constant 0 : index
    %50 = vector.load %arg1[%49, %c0_26, %c0_27] : memref<8x8x128xf32, #tpu.memory_space<vmem>>, vector<1x8x128xf32>
    %51 = vector.shape_cast %50 : vector<1x8x128xf32> to vector<8x128xf32>
    %52 = arith.index_cast %c3_i32 : i32 to index
    %c0_28 = arith.constant 0 : index
    %c0_29 = arith.constant 0 : index
    %53 = vector.load %arg2[%52, %c0_28, %c0_29] : memref<8x128x128xbf16, #tpu.memory_space<vmem>>, vector<1x128x128xbf16>
    %54 = vector.shape_cast %53 : vector<1x128x128xbf16> to vector<128x128xbf16>
    %55 = arith.extf %54 : vector<128x128xbf16> to vector<128x128xf32>
    %cst_30 = arith.constant dense<0.000000e+00> : vector<8x128xf32>
    %56 = tpu.matmul %0, %51, %cst_30 {dimension_numbers = #tpu.dot_dimension_numbers<[1], [0], [0], [1], [0, 0, 1, 1], [], []>} : vector<8x8xf32>, vector<8x128xf32>, vector<8x128xf32> -> vector<8x128xf32>
    %cst_31 = arith.constant dense<0.000000e+00> : vector<8x128xf32>
    %57 = tpu.matmul %56, %55, %cst_31 {dimension_numbers = #tpu.dot_dimension_numbers<[1], [0], [0], [1], [0, 0, 1, 1], [], []>} : vector<8x128xf32>, vector<128x128xf32>, vector<8x128xf32> -> vector<8x128xf32>
    %58 = arith.addf %57, %3 : vector<8x128xf32>
    %59 = arith.addf %58, %51 : vector<8x128xf32>
    %60 = arith.index_cast %c3_i32 : i32 to index
    %c0_32 = arith.constant 0 : index
    %c0_33 = arith.constant 0 : index
    %61 = vector.load %arg5[%60, %c0_32, %c0_33] : memref<8x8x128xf32, #tpu.memory_space<vmem>>, vector<1x8x128xf32>
    %62 = vector.shape_cast %61 : vector<1x8x128xf32> to vector<8x128xf32>
    %63 = vector.shape_cast %59 : vector<8x128xf32> to vector<1x8x128xf32>
    tpu.vector_store %arg5[%60, %c0_32, %c0_33], %63 {strides = array<i32>} : memref<8x8x128xf32, #tpu.memory_space<vmem>>, vector<1x8x128xf32>,
    %c4_i32 = arith.constant 4 : i32
    %64 = arith.index_cast %c4_i32 : i32 to index
    %c0_34 = arith.constant 0 : index
    %c0_35 = arith.constant 0 : index
    %65 = vector.load %arg1[%64, %c0_34, %c0_35] : memref<8x8x128xf32, #tpu.memory_space<vmem>>, vector<1x8x128xf32>
    %66 = vector.shape_cast %65 : vector<1x8x128xf32> to vector<8x128xf32>
    %67 = arith.index_cast %c4_i32 : i32 to index
    %c0_36 = arith.constant 0 : index
    %c0_37 = arith.constant 0 : index
    %68 = vector.load %arg2[%67, %c0_36, %c0_37] : memref<8x128x128xbf16, #tpu.memory_space<vmem>>, vector<1x128x128xbf16>
    %69 = vector.shape_cast %68 : vector<1x128x128xbf16> to vector<128x128xbf16>
    %70 = arith.extf %69 : vector<128x128xbf16> to vector<128x128xf32>
    %cst_38 = arith.constant dense<0.000000e+00> : vector<8x128xf32>
    %71 = tpu.matmul %0, %66, %cst_38 {dimension_numbers = #tpu.dot_dimension_numbers<[1], [0], [0], [1], [0, 0, 1, 1], [], []>} : vector<8x8xf32>, vector<8x128xf32>, vector<8x128xf32> -> vector<8x128xf32>
    %cst_39 = arith.constant dense<0.000000e+00> : vector<8x128xf32>
    %72 = tpu.matmul %71, %70, %cst_39 {dimension_numbers = #tpu.dot_dimension_numbers<[1], [0], [0], [1], [0, 0, 1, 1], [], []>} : vector<8x128xf32>, vector<128x128xf32>, vector<8x128xf32> -> vector<8x128xf32>
    %73 = arith.addf %72, %3 : vector<8x128xf32>
    %74 = arith.addf %73, %66 : vector<8x128xf32>
    %75 = arith.index_cast %c4_i32 : i32 to index
    %c0_40 = arith.constant 0 : index
    %c0_41 = arith.constant 0 : index
    %76 = vector.load %arg5[%75, %c0_40, %c0_41] : memref<8x8x128xf32, #tpu.memory_space<vmem>>, vector<1x8x128xf32>
    %77 = vector.shape_cast %76 : vector<1x8x128xf32> to vector<8x128xf32>
    %78 = vector.shape_cast %74 : vector<8x128xf32> to vector<1x8x128xf32>
    tpu.vector_store %arg5[%75, %c0_40, %c0_41], %78 {strides = array<i32>} : memref<8x8x128xf32, #tpu.memory_space<vmem>>, vector<1x8x128xf32>,
    %c5_i32 = arith.constant 5 : i32
    %79 = arith.index_cast %c5_i32 : i32 to index
    %c0_42 = arith.constant 0 : index
    %c0_43 = arith.constant 0 : index
    %80 = vector.load %arg1[%79, %c0_42, %c0_43] : memref<8x8x128xf32, #tpu.memory_space<vmem>>, vector<1x8x128xf32>
    %81 = vector.shape_cast %80 : vector<1x8x128xf32> to vector<8x128xf32>
    %82 = arith.index_cast %c5_i32 : i32 to index
    %c0_44 = arith.constant 0 : index
    %c0_45 = arith.constant 0 : index
    %83 = vector.load %arg2[%82, %c0_44, %c0_45] : memref<8x128x128xbf16, #tpu.memory_space<vmem>>, vector<1x128x128xbf16>
    %84 = vector.shape_cast %83 : vector<1x128x128xbf16> to vector<128x128xbf16>
    %85 = arith.extf %84 : vector<128x128xbf16> to vector<128x128xf32>
    %cst_46 = arith.constant dense<0.000000e+00> : vector<8x128xf32>
    %86 = tpu.matmul %0, %81, %cst_46 {dimension_numbers = #tpu.dot_dimension_numbers<[1], [0], [0], [1], [0, 0, 1, 1], [], []>} : vector<8x8xf32>, vector<8x128xf32>, vector<8x128xf32> -> vector<8x128xf32>
    %cst_47 = arith.constant dense<0.000000e+00> : vector<8x128xf32>
    %87 = tpu.matmul %86, %85, %cst_47 {dimension_numbers = #tpu.dot_dimension_numbers<[1], [0], [0], [1], [0, 0, 1, 1], [], []>} : vector<8x128xf32>, vector<128x128xf32>, vector<8x128xf32> -> vector<8x128xf32>
    %88 = arith.addf %87, %3 : vector<8x128xf32>
    %89 = arith.addf %88, %81 : vector<8x128xf32>
    %90 = arith.index_cast %c5_i32 : i32 to index
    %c0_48 = arith.constant 0 : index
    %c0_49 = arith.constant 0 : index
    %91 = vector.load %arg5[%90, %c0_48, %c0_49] : memref<8x8x128xf32, #tpu.memory_space<vmem>>, vector<1x8x128xf32>
    %92 = vector.shape_cast %91 : vector<1x8x128xf32> to vector<8x128xf32>
    %93 = vector.shape_cast %89 : vector<8x128xf32> to vector<1x8x128xf32>
    tpu.vector_store %arg5[%90, %c0_48, %c0_49], %93 {strides = array<i32>} : memref<8x8x128xf32, #tpu.memory_space<vmem>>, vector<1x8x128xf32>,
    %c6_i32 = arith.constant 6 : i32
    %94 = arith.index_cast %c6_i32 : i32 to index
    %c0_50 = arith.constant 0 : index
    %c0_51 = arith.constant 0 : index
    %95 = vector.load %arg1[%94, %c0_50, %c0_51] : memref<8x8x128xf32, #tpu.memory_space<vmem>>, vector<1x8x128xf32>
    %96 = vector.shape_cast %95 : vector<1x8x128xf32> to vector<8x128xf32>
    %97 = arith.index_cast %c6_i32 : i32 to index
    %c0_52 = arith.constant 0 : index
    %c0_53 = arith.constant 0 : index
    %98 = vector.load %arg2[%97, %c0_52, %c0_53] : memref<8x128x128xbf16, #tpu.memory_space<vmem>>, vector<1x128x128xbf16>
    %99 = vector.shape_cast %98 : vector<1x128x128xbf16> to vector<128x128xbf16>
    %100 = arith.extf %99 : vector<128x128xbf16> to vector<128x128xf32>
    %cst_54 = arith.constant dense<0.000000e+00> : vector<8x128xf32>
    %101 = tpu.matmul %0, %96, %cst_54 {dimension_numbers = #tpu.dot_dimension_numbers<[1], [0], [0], [1], [0, 0, 1, 1], [], []>} : vector<8x8xf32>, vector<8x128xf32>, vector<8x128xf32> -> vector<8x128xf32>
    %cst_55 = arith.constant dense<0.000000e+00> : vector<8x128xf32>
    %102 = tpu.matmul %101, %100, %cst_55 {dimension_numbers = #tpu.dot_dimension_numbers<[1], [0], [0], [1], [0, 0, 1, 1], [], []>} : vector<8x128xf32>, vector<128x128xf32>, vector<8x128xf32> -> vector<8x128xf32>
    %103 = arith.addf %102, %3 : vector<8x128xf32>
    %104 = arith.addf %103, %96 : vector<8x128xf32>
    %105 = arith.index_cast %c6_i32 : i32 to index
    %c0_56 = arith.constant 0 : index
    %c0_57 = arith.constant 0 : index
    %106 = vector.load %arg5[%105, %c0_56, %c0_57] : memref<8x8x128xf32, #tpu.memory_space<vmem>>, vector<1x8x128xf32>
    %107 = vector.shape_cast %106 : vector<1x8x128xf32> to vector<8x128xf32>
    %108 = vector.shape_cast %104 : vector<8x128xf32> to vector<1x8x128xf32>
    tpu.vector_store %arg5[%105, %c0_56, %c0_57], %108 {strides = array<i32>} : memref<8x8x128xf32, #tpu.memory_space<vmem>>, vector<1x8x128xf32>,
    %c7_i32 = arith.constant 7 : i32
    %109 = arith.index_cast %c7_i32 : i32 to index
    %c0_58 = arith.constant 0 : index
    %c0_59 = arith.constant 0 : index
    %110 = vector.load %arg1[%109, %c0_58, %c0_59] : memref<8x8x128xf32, #tpu.memory_space<vmem>>, vector<1x8x128xf32>
    %111 = vector.shape_cast %110 : vector<1x8x128xf32> to vector<8x128xf32>
    %112 = arith.index_cast %c7_i32 : i32 to index
    %c0_60 = arith.constant 0 : index
    %c0_61 = arith.constant 0 : index
    %113 = vector.load %arg2[%112, %c0_60, %c0_61] : memref<8x128x128xbf16, #tpu.memory_space<vmem>>, vector<1x128x128xbf16>
    %114 = vector.shape_cast %113 : vector<1x128x128xbf16> to vector<128x128xbf16>
    %115 = arith.extf %114 : vector<128x128xbf16> to vector<128x128xf32>
    %cst_62 = arith.constant dense<0.000000e+00> : vector<8x128xf32>
    %116 = tpu.matmul %0, %111, %cst_62 {dimension_numbers = #tpu.dot_dimension_numbers<[1], [0], [0], [1], [0, 0, 1, 1], [], []>} : vector<8x8xf32>, vector<8x128xf32>, vector<8x128xf32> -> vector<8x128xf32>
    %cst_63 = arith.constant dense<0.000000e+00> : vector<8x128xf32>
    %117 = tpu.matmul %116, %115, %cst_63 {dimension_numbers = #tpu.dot_dimension_numbers<[1], [0], [0], [1], [0, 0, 1, 1], [], []>} : vector<8x128xf32>, vector<128x128xf32>, vector<8x128xf32> -> vector<8x128xf32>
    %118 = arith.addf %117, %3 : vector<8x128xf32>
    %119 = arith.addf %118, %111 : vector<8x128xf32>
    %120 = arith.index_cast %c7_i32 : i32 to index
    %c0_64 = arith.constant 0 : index
    %c0_65 = arith.constant 0 : index
    %121 = vector.load %arg5[%120, %c0_64, %c0_65] : memref<8x8x128xf32, #tpu.memory_space<vmem>>, vector<1x8x128xf32>
    %122 = vector.shape_cast %121 : vector<1x8x128xf32> to vector<8x128xf32>
    %123 = vector.shape_cast %119 : vector<8x128xf32> to vector<1x8x128xf32>
    tpu.vector_store %arg5[%120, %c0_64, %c0_65], %123 {strides = array<i32>} : memref<8x8x128xf32, #tpu.memory_space<vmem>>, vector<1x8x128xf32>,
    %c8_i32 = arith.constant 8 : i32
    return
  }
  func.func @transform_0(%arg0: i32) -> (i32, i32, i32) {
    %c0_i32 = arith.constant 0 : i32
    %c0_i32_0 = arith.constant 0 : i32
    %c0_i32_1 = arith.constant 0 : i32
    return %arg0, %c0_i32, %c0_i32_0 : i32, i32, i32
  }
  func.func @transform_1(%arg0: i32) -> (i32, i32, i32) {
    %c0_i32 = arith.constant 0 : i32
    %c0_i32_0 = arith.constant 0 : i32
    %c0_i32_1 = arith.constant 0 : i32
    return %arg0, %c0_i32, %c0_i32_0 : i32, i32, i32
  }
  func.func @transform_2(%arg0: i32) -> (i32, i32) {
    %c0_i32 = arith.constant 0 : i32
    %c0_i32_0 = arith.constant 0 : i32
    %c0_i32_1 = arith.constant 0 : i32
    return %c0_i32, %c0_i32_0 : i32, i32
  }
  func.func @transform_3(%arg0: i32) -> (i32, i32) {
    %c0_i32 = arith.constant 0 : i32
    %c0_i32_0 = arith.constant 0 : i32
    %c0_i32_1 = arith.constant 0 : i32
    return %c0_i32, %c0_i32_0 : i32, i32
  }
  func.func @transform_4(%arg0: i32) -> (i32, i32, i32) {
    %c0_i32 = arith.constant 0 : i32
    %c0_i32_0 = arith.constant 0 : i32
    %c0_i32_1 = arith.constant 0 : i32
    return %arg0, %c0_i32, %c0_i32_0 : i32, i32, i32
  }
}

</mosaic_0001>

<bundles_post_ra>
// kernel: tpu_custom_call.1
= control target key start
LH: loop header
LB: loop body
LE: loop exit
PB: predicated region body
PF: predicated region fallthrough
CT: control target
= control target key end

     0   :  { %9 = vsyncpa [#allocation3], 0  ;;  %s1227_s0 = inlined_call_operand.hbm [shape: f32[8,8,128], index: 0, kind: input, shape index: {}]   ;;  %s1228_s1 = inlined_call_operand.hbm [shape: bf16[8,128,128], index: 1, kind: input, shape index: {}]   ;;  %s1229_s2 = inlined_call_operand.vmem [shape: f32[8,8], index: 2, kind: input, shape index: {}]   ;;  %s1230_s3 = inlined_call_operand.vmem [shape: f32[8,1], index: 3, kind: input, shape index: {}]   ;;  %s1231_s4 = inlined_call_operand.hbm [shape: f32[8,8,128], index: 4, kind: output, shape index: {}]  }
   0x1   :  { %10 = vsyncpa [#allocation6], 0 }
   0x2   :  { %11 = vsyncpa [#allocation4], 0  ;;  %s16_s17 = sshll.u32 %s1227_s0, 4  ;;  %s1109_s18 = smov [#allocation2]   ;;  %s17_s17 = int_to_ptr.hbm [resolvable:$true] %s16_s17 }
   0x3   :  { %s18_s19 = sshll.u32 %s1109_s18, 4  ;;  %s29_s22 = sshll.u32 %s1228_s1, 4  ;;  %s19_s19 = int_to_ptr.vmem [resolvable:$true] %s18_s19  ;;  %s30_s22 = int_to_ptr.hbm [resolvable:$true] %s29_s22 }
   0x4   :  { %s1110_s23 = smov 128   ;;  %s1111_s24 = smov 8  }
   0x5   :  { %24 = dma.hbm_to_vmem [thread:$0]  %s17_s17, 1024, %s19_s19, [#allocation3], %s1110_s23, %s1110_s23, %s1111_s24  }
   0x6   :  { %s1112_s25 = smov [#allocation5]   ;;  %s1113_s27 = smov 64  }
   0x7   :  { %s31_s26 = sshll.u32 %s1112_s25, 4  ;;  %s1114_s0 = smov 4   ;;  %s32_s26 = int_to_ptr.vmem [resolvable:$true] %s31_s26 }
   0x8   :  { %37 = dma.hbm_to_vmem [thread:$0]  %s30_s22, 8192, %s32_s26, [#allocation6], %s1113_s27, %s1113_s27, %s1114_s0  }
   0x9   :  { %1103 = dma.done.wait [#allocation3], 1024  }
   0xa   :  { %1104 = vsyncadd [#allocation3], 4294966272 }
   0xb   :  { %1105 = dma.done.wait [#allocation6], 8192  }
   0xc   :  { %1106 = vsyncadd [#allocation6], 4294959104  ;;  %vm90_vm0 = vcmask 64512   ;;  %v1151_v0 = vld [vmem:[#allocation2] sm:$0xff]  ;;  %v972_v2 = vld [vmem:[#allocation5 + $0x38] sm:$0xff]   ;;  %v1115_v32 = vmov 0  }
   0xd   :  { %v1156_v1 = vld [vmem:[%s1229_s2] sm:$0xff]  ;;  %109 = vmatpush.msra.mxu1 %v1151_v0  ;;  %v741_v3 = vunpack.c.h.bf16 %v972_v2  ;;  %v740_v4 = vunpack.c.l.bf16 %v972_v2  ;;  %v971_v5 = vld [vmem:[#allocation5 + $0x30] sm:$0xff]   ;;  %v1161_v7 = vld [vmem:[#allocation2 + $0x8] sm:$0xff]  ;;  %1030 = vset.pattern.permute.xlu0 %v1115_v32  ;;  %s688_s7 = sshll.u32 %s1231_s4, 4  ;;  %s689_s7 = int_to_ptr.hbm [resolvable:$true] %s688_s7 }
   0xe   :  { %702 = vmatmul.msk.f32.vlgmr.msra.gmra.mxu1 %vm90_vm0, %v1156_v1  ;;  %v737_v6 = vunpack.c.h.bf16 %v971_v5  ;;  %v1163_v8 = vld [vmem:[#allocation2 + $0x10] sm:$0xff]  ;;  %v970_v9 = vld [vmem:[#allocation5 + $0x28] sm:$0xff]   ;;  %186 = vmatpush.msra.mxu3 %v1161_v7  ;;  %v736_v10 = vunpack.c.l.bf16 %v971_v5  ;;  %v969_v12 = vld [vmem:[#allocation5 + $0x20] sm:$0xff]  }
   0xf   :  { %114 = vmatpush.msrb.mxu1 %v741_v3  ;;  %264 = vmatpush.msra.mxu0 %v1163_v8  ;;  %v733_v11 = vunpack.c.h.bf16 %v970_v9  ;;  %v732_v13 = vunpack.c.l.bf16 %v970_v9  ;;  %v729_v14 = vunpack.c.h.bf16 %v969_v12  ;;  %v968_v15 = vld [vmem:[#allocation5 + $0x18] sm:$0xff]   ;;  %v728_v16 = vunpack.c.l.bf16 %v969_v12  ;;  %v967_v18 = vld [vmem:[#allocation5 + $0x10] sm:$0xff]   ;;  %v966_v21 = vld [vmem:[#allocation5 + $0x8] sm:$0xff]  }
  0x10   :  { %703 = vmatmul.msk.f32.vlgmr.msra.gmra.mxu3 %vm90_vm0, %v1156_v1  ;;  %704 = vmatmul.msk.f32.vlgmr.msra.gmra.mxu0 %vm90_vm0, %v1156_v1  ;;  %v725_v17 = vunpack.c.h.bf16 %v968_v15  ;;  %v724_v19 = vunpack.c.l.bf16 %v968_v15  ;;  %v721_v20 = vunpack.c.h.bf16 %v967_v18  ;;  %v720_v22 = vunpack.c.l.bf16 %v967_v18  ;;  %v711_v24 = vld [vmem:[#allocation5] sm:$0xff]   ;;  %v979_v30 = vld [vmem:[#allocation5 + $0x78] sm:$0xff]   ;;  %v978_v31 = vld [vmem:[#allocation5 + $0x70] sm:$0xff]  }
  0x11   :  { %115 = vmatpush.msrb.mxu1 %v740_v4  ;;  %v717_v23 = vunpack.c.h.bf16 %v966_v21  ;;  %v716_v25 = vunpack.c.l.bf16 %v966_v21  ;;  %v713_v26 = vunpack.c.h.bf16 %v711_v24  ;;  %v712_v27 = vunpack.c.l.bf16 %v711_v24  ;;  %v1171_v28 = vld [vmem:[#allocation2 + $0x20] sm:$0xff]  ;;  %v986_v35 = vld [vmem:[#allocation5 + $0xb8] sm:$0xff]   ;;  %v985_v36 = vld [vmem:[#allocation5 + $0xb0] sm:$0xff]  }
  0x12   :  { %v51_v29 = vld [vmem:[%s1230_s3] sm:$0xff]  ;;  %v773_v33 = vunpack.c.h.bf16 %v979_v30  ;;  %v772_v34 = vunpack.c.l.bf16 %v979_v30  ;;  %v769_v37 = vunpack.c.h.bf16 %v978_v31  ;;  %v805_v38 = vunpack.c.h.bf16 %v986_v35  ;;  %v977_v40 = vld [vmem:[#allocation5 + $0x68] sm:$0xff]   ;;  %v975_v52 = vld [vmem:[#allocation5 + $0x58] sm:$0xff]   ;;  %s1116_s3 = smov [#allocation7]  }
  0x13   :  { %116 = vmatpush.msrb.mxu1 %v737_v6  ;;  %54 = vperm.xlu0 %1030, %v51_v29   ;;  %v804_v39 = vunpack.c.l.bf16 %v986_v35  ;;  %v768_v41 = vunpack.c.l.bf16 %v978_v31  ;;  %v801_v42 = vunpack.c.h.bf16 %v985_v36  ;;  %v984_v43 = vld [vmem:[#allocation5 + $0xa8] sm:$0xff]   ;;  %v765_v44 = vunpack.c.h.bf16 %v977_v40  ;;  %v976_v46 = vld [vmem:[#allocation5 + $0x60] sm:$0xff]   ;;  %v982_v55 = vld [vmem:[#allocation5 + $0x98] sm:$0xff]   ;;  %s686_s30 = sshll.u32 %s1116_s3, 4  ;;  %s687_s30 = int_to_ptr.vmem [resolvable:$true] %s686_s30 }
  0x14   :  { %191 = vmatpush.msrb.mxu3 %v773_v33  ;;  %269 = vmatpush.msra.mxu2 %v805_v38  ;;  %v800_v45 = vunpack.c.l.bf16 %v985_v36  ;;  %v764_v47 = vunpack.c.l.bf16 %v977_v40  ;;  %v797_v48 = vunpack.c.h.bf16 %v984_v43  ;;  %v983_v49 = vld [vmem:[#allocation5 + $0xa0] sm:$0xff]   ;;  %v761_v50 = vunpack.c.h.bf16 %v976_v46  ;;  %v974_v58 = vld [vmem:[#allocation5 + $0x50] sm:$0xff]   ;;  %v973_v2 = vld [vmem:[#allocation5 + $0x48] sm:$0xff]  }
  0x15   :  { %117 = vmatpush.msrb.mxu1 %v736_v10  ;;  %v796_v51 = vunpack.c.l.bf16 %v984_v43  ;;  %v760_v53 = vunpack.c.l.bf16 %v976_v46  ;;  %v793_v54 = vunpack.c.h.bf16 %v983_v49  ;;  %v757_v56 = vunpack.c.h.bf16 %v975_v52  ;;  %v981_v61 = vld [vmem:[#allocation5 + $0x90] sm:$0xff]   ;;  %v980_v5 = vld [vmem:[#allocation5 + $0x88] sm:$0xff]   ;;  %v1177_v6 = vld [vmem:[#allocation2 + $0x18] sm:$0xff] }
  0x16   :  { %192 = vmatpush.msrb.mxu3 %v772_v34  ;;  %270 = vmatpush.msra.mxu2 %v804_v39  ;;  %v792_v57 = vunpack.c.l.bf16 %v983_v49  ;;  %v756_v59 = vunpack.c.l.bf16 %v975_v52  ;;  %v789_v60 = vunpack.c.h.bf16 %v982_v55  ;;  %v753_v62 = vunpack.c.h.bf16 %v974_v58  ;;  %v743_v12 = vld [vmem:[#allocation5 + $0x40] sm:$0xff]   ;;  %v998_v29 = vld [vmem:[#allocation5 + $0x128] sm:$0xff]   ;;  %v996_v35 = vld [vmem:[#allocation5 + $0x118] sm:$0xff]  }
  0x17   :  { %118 = vmatpush.msrb.mxu1 %v733_v11  ;;  %v788_v63 = vunpack.c.l.bf16 %v982_v55  ;;  %v752_v3 = vunpack.c.l.bf16 %v974_v58  ;;  %v785_v4 = vunpack.c.h.bf16 %v981_v61  ;;  %v749_v10 = vunpack.c.h.bf16 %v973_v2  ;;  %342 = vmatpush.msrb.mxu0 %v1177_v6  ;;  %v775_v15 = vld [vmem:[#allocation5 + $0x80] sm:$0xff]   ;;  %v995_v38 = vld [vmem:[#allocation5 + $0x110] sm:$0xff]  }
  0x18   :  { %193 = vmatpush.msrb.mxu3 %v769_v37  ;;  %271 = vmatpush.msra.mxu2 %v801_v42  ;;  %v784_v11 = vunpack.c.l.bf16 %v981_v61  ;;  %v780_v18 = vunpack.c.l.bf16 %v980_v5  ;;  %v861_v31 = vunpack.c.h.bf16 %v998_v29  ;;  %v997_v32 = vld [vmem:[#allocation5 + $0x120] sm:$0xff]   ;;  %v860_v33 = vunpack.c.l.bf16 %v998_v29  ;;  %v994_v42 = vld [vmem:[#allocation5 + $0x108] sm:$0xff]   ;;  %v992_v52 = vld [vmem:[#allocation5 + $0xf0] sm:$0xff]  }
  0x19   :  { %119 = vmatpush.msrb.mxu1 %v732_v13  ;;  %v748_v13 = vunpack.c.l.bf16 %v973_v2  ;;  %705 = vmatmul.msk.f32.vlgmr.msrb.gmra.mxu0 %vm90_vm0, %v1156_v1  ;;  %v857_v34 = vunpack.c.h.bf16 %v997_v32  ;;  %v856_v36 = vunpack.c.l.bf16 %v997_v32  ;;  %v853_v37 = vunpack.c.h.bf16 %v996_v35  ;;  %v839_v46 = vld [vmem:[#allocation5 + $0x100] sm:$0xff]   ;;  %v1021_v61 = vld [vmem:[#allocation5 + $0x1f8] sm:$0xff]  }
  0x1a   :  { %194 = vmatpush.msrb.mxu3 %v768_v41  ;;  %272 = vmatpush.msra.mxu2 %v800_v45  ;;  %v852_v39 = vunpack.c.l.bf16 %v996_v35  ;;  %v849_v40 = vunpack.c.h.bf16 %v995_v38  ;;  %v848_v41 = vunpack.c.l.bf16 %v995_v38  ;;  %v844_v45 = vunpack.c.l.bf16 %v994_v42  ;;  %v989_v2 = vld [vmem:[#allocation5 + $0xd8] sm:$0xff]   ;;  %v1018_v32 = vld [vmem:[#allocation5 + $0x1e0] sm:$0xff]  }
  0x1b   :  { %120 = vmatpush.msrb.mxu1 %v729_v14  ;;  %v781_v14 = vunpack.c.h.bf16 %v980_v5  ;;  %v840_v49 = vunpack.c.l.bf16 %v839_v46  ;;  %v833_v55 = vunpack.c.h.bf16 %v992_v52  ;;  %v953_v35 = vunpack.c.h.bf16 %v1018_v32 }
  0x1c   :  { %195 = vmatpush.msrb.mxu3 %v765_v44  ;;  %273 = vmatpush.msra.mxu2 %v797_v48  ;;  %v845_v44 = vunpack.c.h.bf16 %v994_v42  ;;  %v1189_v48 = vld [vmem:[#allocation2 + $0x38] sm:$0xff]  ;;  %v952_v38 = vunpack.c.l.bf16 %v1018_v32  ;;  %v1201_v42 = vld [vmem:[#allocation5 + $0x160] sm:$0xff]  }
  0x1d   :  { %121 = vmatpush.msrb.mxu1 %v728_v16  ;;  %v745_v16 = vunpack.c.h.bf16 %v743_v12 }
  0x1e   :  { %196 = vmatpush.msrb.mxu3 %v764_v47  ;;  %274 = vmatpush.msra.mxu2 %v796_v51  ;;  %v841_v47 = vunpack.c.h.bf16 %v839_v46  ;;  %v993_v51 = vld [vmem:[#allocation5 + $0xf8] sm:$0xff]   ;;  %v889_v46 = vunpack.c.h.bf16 %v1201_v42 }
  0x1f   :  { %122 = vmatpush.msrb.mxu1 %v725_v17  ;;  %v1000_v17 = vld [vmem:[#allocation5 + $0x138] sm:$0xff]  }
  0x20   :  { %197 = vmatpush.msrb.mxu3 %v761_v50  ;;  %275 = vmatpush.msra.mxu2 %v793_v54  ;;  %v869_v21 = vunpack.c.h.bf16 %v1000_v17  ;;  %v868_v24 = vunpack.c.l.bf16 %v1000_v17  ;;  %v1194_v50 = vld [vmem:[#allocation2 + $0x28] sm:$0xff]  ;;  %v836_v54 = vunpack.c.l.bf16 %v993_v51 }
  0x21   :  { %123 = vmatpush.msrb.mxu1 %v724_v19  ;;  %v744_v19 = vunpack.c.l.bf16 %v743_v12  ;;  %v821_v12 = vunpack.c.h.bf16 %v989_v2 }
  0x22   :  { %198 = vmatpush.msrb.mxu3 %v760_v53  ;;  %276 = vmatpush.msra.mxu2 %v792_v57  ;;  %v837_v53 = vunpack.c.h.bf16 %v993_v51  ;;  %v832_v57 = vunpack.c.l.bf16 %v992_v52  ;;  %v1013_v52 = vld [vmem:[#allocation5 + $0x1b0] sm:$0xff]  }
  0x23   :  { %124 = vmatpush.msrb.mxu1 %v721_v20  ;;  %v777_v20 = vunpack.c.h.bf16 %v775_v15 }
  0x24   :  { %199 = vmatpush.msrb.mxu3 %v757_v56  ;;  %277 = vmatpush.msra.mxu2 %v789_v60  ;;  %v991_v56 = vld [vmem:[#allocation5 + $0xe8] sm:$0xff]  }
  0x25   :  { %125 = vmatpush.msrb.mxu1 %v720_v22  ;;  %v999_v22 = vld [vmem:[#allocation5 + $0x130] sm:$0xff]   ;;  %347 = vmatpush.msra.mxu0 %v837_v53  ;;  %v829_v58 = vunpack.c.h.bf16 %v991_v56  ;;  %v828_v60 = vunpack.c.l.bf16 %v991_v56  ;;  %v929_v56 = vunpack.c.h.bf16 %v1013_v52 }
  0x26   :  { %200 = vmatpush.msrb.mxu3 %v756_v59  ;;  %278 = vmatpush.msra.mxu2 %v788_v63  ;;  %v864_v30 = vunpack.c.l.bf16 %v999_v22  ;;  %v990_v59 = vld [vmem:[#allocation5 + $0xe0] sm:$0xff]   ;;  %v965_v63 = vunpack.c.h.bf16 %v1021_v61 }
  0x27   :  { %126 = vmatpush.msrb.mxu1 %v717_v23  ;;  %v776_v23 = vunpack.c.l.bf16 %v775_v15  ;;  %348 = vmatpush.msra.mxu0 %v836_v54  ;;  %v824_v5 = vunpack.c.l.bf16 %v990_v59 }
  0x28   :  { %201 = vmatpush.msrb.mxu3 %v753_v62  ;;  %279 = vmatpush.msra.mxu2 %v785_v4  ;;  %v825_v62 = vunpack.c.h.bf16 %v990_v59  ;;  %v928_v59 = vunpack.c.l.bf16 %v1013_v52 }
  0x29   :  { %127 = vmatpush.msrb.mxu1 %v716_v25  ;;  %349 = vmatpush.msra.mxu0 %v833_v55 }
  0x2a   :  { %202 = vmatpush.msrb.mxu3 %v752_v3  ;;  %280 = vmatpush.msra.mxu2 %v784_v11  ;;  %v964_v3 = vunpack.c.l.bf16 %v1021_v61 }
  0x2b   :  { %128 = vmatpush.msrb.mxu1 %v713_v26  ;;  %v865_v26 = vunpack.c.h.bf16 %v999_v22  ;;  %350 = vmatpush.msra.mxu0 %v832_v57  ;;  %v1006_v22 = vld [vmem:[#allocation5 + $0x170] sm:$0xff]  }
  0x2c   :  { %203 = vmatpush.msrb.mxu3 %v749_v10  ;;  %281 = vmatpush.msra.mxu2 %v781_v14  ;;  %v1007_v10 = vld [vmem:[#allocation5 + $0x178] sm:$0xff]  }
  0x2d   :  { %129 = vmatpush.msrb.mxu1 %v712_v27  ;;  %v1184_v27 = vld [vmem:[#allocation2 + $0x30] sm:$0xff]  ;;  %351 = vmatpush.msra.mxu0 %v829_v58  ;;  %v901_v14 = vunpack.c.h.bf16 %v1007_v10  ;;  %v1012_v58 = vld [vmem:[#allocation5 + $0x1a8] sm:$0xff]  }
  0x2e   :  { %204 = vmatpush.msrb.mxu3 %v748_v13  ;;  %282 = vmatpush.msra.mxu2 %v780_v18  ;;  %v900_v18 = vunpack.c.l.bf16 %v1007_v10  ;;  %v925_v61 = vunpack.c.h.bf16 %v1012_v58 }
  0x2f   :  { %420 = vmatpush.msra.mxu1 %v1171_v28  ;;  %352 = vmatpush.msra.mxu0 %v828_v60 }
  0x30   :  { %205 = vmatpush.msrb.mxu3 %v745_v16  ;;  %283 = vmatpush.msra.mxu2 %v777_v20  ;;  %v988_v16 = vld [vmem:[#allocation5 + $0xd0] sm:$0xff]  }
  0x31   :  { %353 = vmatpush.msra.mxu0 %v825_v62  ;;  %v1011_v62 = vld [vmem:[#allocation5 + $0x1a0] sm:$0xff]  }
  0x32   :  { %206 = vmatpush.msrb.mxu3 %v744_v19  ;;  %284 = vmatpush.msra.mxu2 %v776_v23  ;;  %v820_v19 = vunpack.c.l.bf16 %v989_v2  ;;  %v817_v23 = vunpack.c.h.bf16 %v988_v16  ;;  %v1010_v2 = vld [vmem:[#allocation5 + $0x198] sm:$0xff]  }
  0x33   :  { %354 = vmatpush.msra.mxu0 %v824_v5  ;;  %v917_v5 = vunpack.c.h.bf16 %v1010_v2  ;;  %v916_v10 = vunpack.c.l.bf16 %v1010_v2 }
  0x34   :  { %425 = vmatpush.msra.mxu3 %v869_v21  ;;  %576 = vmatpush.msrb.mxu2 %v1184_v27  ;;  %v1019_v21 = vld [vmem:[#allocation5 + $0x1e8] sm:$0xff]  }
  0x35   :  { %355 = vmatpush.msra.mxu0 %v821_v12  ;;  %v956_v29 = vunpack.c.l.bf16 %v1019_v21  ;;  %v1008_v12 = vld [vmem:[#allocation5 + $0x188] sm:$0xff]  }
  0x36   :  { %426 = vmatpush.msra.mxu3 %v868_v24  ;;  %v957_v24 = vunpack.c.h.bf16 %v1019_v21 }
  0x37   :  { %356 = vmatpush.msra.mxu0 %v820_v19 }
  0x38   :  { %427 = vmatpush.msra.mxu3 %v865_v26  ;;  %v987_v26 = vld [vmem:[#allocation5 + $0xc8] sm:$0xff]  }
  0x39   :  { %357 = vmatpush.msra.mxu0 %v817_v23  ;;  %v1015_v23 = vld [vmem:[#allocation5 + $0x1c8] sm:$0xff]  }
  0x3a   :  { %428 = vmatpush.msra.mxu3 %v864_v30  ;;  %v896_v30 = vunpack.c.l.bf16 %v1006_v22  ;;  %v940_v32 = vunpack.c.l.bf16 %v1015_v23 }
  0x3c   :  { %429 = vmatpush.msra.mxu3 %v861_v31  ;;  %v816_v31 = vunpack.c.l.bf16 %v988_v16  ;;  %v903_v16 = vld [vmem:[#allocation5 + $0x180] sm:$0xff]  }
  0x3d   :  { %v905_v19 = vunpack.c.h.bf16 %v903_v16 }
  0x3e   :  { %430 = vmatpush.msra.mxu3 %v860_v33  ;;  %v1005_v33 = vld [vmem:[#allocation5 + $0x168] sm:$0xff]   ;;  %358 = vmatpush.msra.mxu0 %v816_v31 }
  0x40   :  { %431 = vmatpush.msra.mxu3 %v857_v34  ;;  %v813_v34 = vunpack.c.h.bf16 %v987_v26 }
  0x42   :  { %432 = vmatpush.msra.mxu3 %v856_v36  ;;  %v893_v36 = vunpack.c.h.bf16 %v1005_v33  ;;  %359 = vmatpush.msra.mxu0 %v813_v34 }
  0x44   :  { %433 = vmatpush.msra.mxu3 %v853_v37  ;;  %v807_v37 = vld [vmem:[#allocation5 + $0xc0] sm:$0xff]  }
  0x46   :  { %434 = vmatpush.msra.mxu3 %v852_v39  ;;  %v892_v39 = vunpack.c.l.bf16 %v1005_v33 }
  0x48   :  { %435 = vmatpush.msra.mxu3 %v849_v40  ;;  %v812_v40 = vunpack.c.l.bf16 %v987_v26 }
  0x4a   :  { %436 = vmatpush.msra.mxu3 %v848_v41  ;;  %v1017_v41 = vld [vmem:[#allocation5 + $0x1d8] sm:$0xff]   ;;  %360 = vmatpush.msra.mxu0 %v812_v40 }
  0x4c   :  { %437 = vmatpush.msra.mxu3 %v845_v44  ;;  %v1014_v44 = vld [vmem:[#allocation5 + $0x1b8] sm:$0xff]  }
  0x4d   :  { %v933_v51 = vunpack.c.h.bf16 %v1014_v44  ;;  %v932_v53 = vunpack.c.l.bf16 %v1014_v44 }
  0x4e   :  { %438 = vmatpush.msra.mxu3 %v844_v45  ;;  %v949_v45 = vunpack.c.h.bf16 %v1017_v41 }
  0x50   :  { %439 = vmatpush.msra.mxu3 %v841_v47  ;;  %v948_v47 = vunpack.c.l.bf16 %v1017_v41 }
  0x52   :  { %440 = vmatpush.msra.mxu3 %v840_v49  ;;  %v808_v49 = vunpack.c.l.bf16 %v807_v37 }
  0x85   :  { %v1197_v4 = vpop.permute.xlu0 %54 }
  0x8b   :  { %v111_v9 = vpop.f32.mrf.mxu1 }
  0x8c   :  { %130 = vmatmul.f32.vlgmr.msrb.gmra.mxu1 %v111_v9  ;;  %v1020_v9 = vld [vmem:[#allocation5 + $0x1f0] sm:$0xff]  }
  0x8d   :  { %v266_v25 = vpop.f32.mrf.mxu0  ;;  %v961_v13 = vunpack.c.h.bf16 %v1020_v9  ;;  %v960_v17 = vunpack.c.l.bf16 %v1020_v9  ;;  %503 = vmatpush.msrb.mxu1 %v901_v14  ;;  %v1009_v9 = vld [vmem:[#allocation5 + $0x190] sm:$0xff]   ;;  %v908_v14 = vunpack.c.l.bf16 %v1008_v12 }
  0x8e   :  { %285 = vmatmul.f32.vlgmr.msra.gmra.mxu2 %v266_v25  ;;  %v897_v25 = vunpack.c.h.bf16 %v1006_v22  ;;  %v904_v22 = vunpack.c.l.bf16 %v903_v16 }
  0x8f   :  { %654 = vmatpush.msra.mxu2 %v1189_v48  ;;  %504 = vmatpush.msrb.mxu1 %v900_v18  ;;  %v1003_v18 = vld [vmem:[#allocation5 + $0x158] sm:$0xff]  }
  0x90   :  { %v885_v21 = vunpack.c.h.bf16 %v1003_v18  ;;  %v884_v26 = vunpack.c.l.bf16 %v1003_v18 }
  0x91   :  { %505 = vmatpush.msrb.mxu1 %v897_v25 }
  0x93   :  { %v188_v43 = vpop.f32.mrf.mxu3  ;;  %506 = vmatpush.msrb.mxu1 %v896_v30  ;;  %v941_v30 = vunpack.c.h.bf16 %v1015_v23 }
  0x94   :  { %706 = vmatmul.msk.f32.vlgmr.msra.gmra.mxu1 %vm90_vm0, %v1156_v1  ;;  %207 = vmatmul.f32.vlgmr.msrb.gmra.mxu3 %v188_v43  ;;  %v809_v43 = vunpack.c.h.bf16 %v807_v37 }
  0x95   :  { %498 = vmatpush.msrb.mxu3 %v1194_v50  ;;  %507 = vmatpush.msrb.mxu1 %v893_v36 }
  0x96   :  { %708 = vmatmul.msk.f32.vlgmr.msrb.gmra.mxu2 %vm90_vm0, %v1156_v1  ;;  %361 = vmatpush.msra.mxu0 %v809_v43  ;;  %v344_v54 = vpop.f32.mrf.mxu0  ;;  %v871_v43 = vld [vmem:[#allocation5 + $0x140] sm:$0xff]  }
  0x97   :  { %659 = vmatpush.msrb.mxu2 %v965_v63  ;;  %508 = vmatpush.msrb.mxu1 %v892_v39  ;;  %v921_v63 = vunpack.c.h.bf16 %v1011_v62  ;;  %v873_v44 = vunpack.c.h.bf16 %v871_v43 }
  0x98   :  { %362 = vmatpush.msra.mxu0 %v808_v49 }
  0x99   :  { %660 = vmatpush.msrb.mxu2 %v964_v3  ;;  %509 = vmatpush.msrb.mxu1 %v889_v46  ;;  %v920_v3 = vunpack.c.l.bf16 %v1011_v62 }
  0x9a   :  { %581 = vmatpush.msrb.mxu0 %v933_v51 }
  0x9b   :  { %661 = vmatpush.msrb.mxu2 %v961_v13  ;;  %363 = vmatmul.f32.vlgmr.msra.gmra.mxu0 %v344_v54  ;;  %v909_v13 = vunpack.c.h.bf16 %v1008_v12 }
  0x9c   :  { %582 = vmatpush.msrb.mxu0 %v932_v53 }
  0x9d   :  { %662 = vmatpush.msrb.mxu2 %v960_v17  ;;  %v1016_v17 = vld [vmem:[#allocation5 + $0x1d0] sm:$0xff]  }
  0x9e   :  { %709 = vmatmul.msk.f32.vlgmr.msra.gmra.mxu2 %vm90_vm0, %v1156_v1  ;;  %583 = vmatpush.msrb.mxu0 %v929_v56  ;;  %v944_v25 = vunpack.c.l.bf16 %v1016_v17 }
  0x9f   :  { %663 = vmatpush.msrb.mxu2 %v957_v24  ;;  %v1002_v24 = vld [vmem:[#allocation5 + $0x150] sm:$0xff]  }
  0xa0   :  { %584 = vmatpush.msrb.mxu0 %v928_v59  ;;  %v881_v31 = vunpack.c.h.bf16 %v1002_v24  ;;  %v880_v36 = vunpack.c.l.bf16 %v1002_v24 }
  0xa1   :  { %664 = vmatpush.msrb.mxu2 %v956_v29 }
  0xa2   :  { %585 = vmatpush.msrb.mxu0 %v925_v61 }
  0xa3   :  { %665 = vmatpush.msrb.mxu2 %v953_v35  ;;  %v935_v35 = vld [vmem:[#allocation5 + $0x1c0] sm:$0xff]  }
  0xa4   :  { %v937_v37 = vunpack.c.h.bf16 %v935_v35  ;;  %v936_v40 = vunpack.c.l.bf16 %v935_v35 }
  0xa5   :  { %666 = vmatpush.msrb.mxu2 %v952_v38  ;;  %v1001_v38 = vld [vmem:[#allocation5 + $0x148] sm:$0xff]  }
  0xa6   :  { %v877_v39 = vunpack.c.h.bf16 %v1001_v38 }
  0xa7   :  { %667 = vmatpush.msrb.mxu2 %v949_v45  ;;  %v872_v45 = vunpack.c.l.bf16 %v871_v43 }
  0xa9   :  { %668 = vmatpush.msrb.mxu2 %v948_v47 }
 0x109   :  { %v131_v11 = vpop.f32.mrf.mxu1 }
 0x10a   :  { %v132_v15 = vadd.f32 %v131_v11, %v1197_v4  ;;  %v913_v11 = vunpack.c.h.bf16 %v1009_v9 }
 0x10c   :  { %v134_v20 = vadd.f32 %v132_v15, %v1151_v0  ;;  %v888_v15 = vunpack.c.l.bf16 %v1201_v42  ;;  %v876_v42 = vunpack.c.l.bf16 %v1001_v38 }
 0x10e   :  { %135 = vst [vmem:[#allocation7] sm:$0xff] %v134_v20  ;;  %v945_v20 = vunpack.c.h.bf16 %v1016_v17  ;;  %510 = vmatpush.msrb.mxu1 %v888_v15 }
 0x110   :  { %669 = vmatpush.msrb.mxu2 %v945_v20  ;;  %511 = vmatpush.msrb.mxu1 %v885_v21 }
 0x111   :  { %v422_v0 = vpop.f32.mrf.mxu1  ;;  %v286_v55 = vpop.f32.mrf.mxu2 }
 0x112   :  { %441 = vmatmul.f32.vlgmr.msra.gmra.mxu3 %v422_v0  ;;  %v287_v57 = vadd.f32 %v286_v55, %v1197_v4  ;;  %670 = vmatpush.msrb.mxu2 %v944_v25 }
 0x113   :  { %512 = vmatpush.msrb.mxu1 %v884_v26 }
 0x114   :  { %v289_v60 = vadd.f32 %v287_v57, %v1163_v8  ;;  %v912_v8 = vunpack.c.l.bf16 %v1009_v9  ;;  %671 = vmatpush.msrb.mxu2 %v941_v30 }
 0x115   :  { %513 = vmatpush.msrb.mxu1 %v881_v31 }
 0x116   :  { %291 = vst [vmem:[#allocation7 + $0x10] sm:$0xff] %v289_v60  ;;  %672 = vmatpush.msrb.mxu2 %v940_v32 }
 0x117   :  { %v208_v33 = vpop.f32.mrf.mxu3  ;;  %514 = vmatpush.msrb.mxu1 %v880_v36 }
 0x118   :  { %v209_v0 = vadd.f32 %v208_v33, %v1197_v4  ;;  %673 = vmatpush.msrb.mxu2 %v937_v37  ;;  %v364_v49 = vpop.f32.mrf.mxu0 }
 0x119   :  { %v578_v29 = vpop.f32.mrf.mxu2  ;;  %515 = vmatpush.msrb.mxu1 %v877_v39  ;;  %v365_v51 = vadd.f32 %v364_v49, %v1197_v4 }
 0x11a   :  { %707 = vmatmul.msk.f32.vlgmr.msrb.gmra.mxu3 %vm90_vm0, %v1156_v1  ;;  %v924_v1 = vunpack.c.l.bf16 %v1012_v58  ;;  %v211_v34 = vadd.f32 %v209_v0, %v1161_v7  ;;  %674 = vmatpush.msrb.mxu2 %v936_v40 }
 0x11b   :  { %516 = vmatpush.msrb.mxu1 %v876_v42  ;;  %v367_v53 = vadd.f32 %v365_v51, %v1177_v6 }
 0x11c   :  { %586 = vmatpush.msrb.mxu0 %v924_v1  ;;  %213 = vst [vmem:[#allocation7 + $0x8] sm:$0xff] %v211_v34 }
 0x11d   :  { %517 = vmatpush.msrb.mxu1 %v873_v44  ;;  %369 = vst [vmem:[#allocation7 + $0x18] sm:$0xff] %v367_v53 }
 0x11e   :  { %587 = vmatpush.msrb.mxu0 %v921_v63 }
 0x11f   :  { %518 = vmatpush.msrb.mxu1 %v872_v45 }
 0x120   :  { %588 = vmatpush.msrb.mxu0 %v920_v3 }
 0x121   :  { %v656_v41 = vpop.f32.mrf.mxu2 }
 0x122   :  { %589 = vmatpush.msrb.mxu0 %v917_v5  ;;  %675 = vmatmul.f32.vlgmr.msrb.gmra.mxu2 %v656_v41 }
 0x124   :  { %590 = vmatpush.msrb.mxu0 %v916_v10 }
 0x126   :  { %591 = vmatpush.msrb.mxu0 %v913_v11 }
 0x128   :  { %592 = vmatpush.msrb.mxu0 %v912_v8 }
 0x12a   :  { %593 = vmatpush.msrb.mxu0 %v909_v13 }
 0x12c   :  { %594 = vmatpush.msrb.mxu0 %v908_v14 }
 0x12e   :  { %595 = vmatpush.msrb.mxu0 %v905_v19 }
 0x130   :  { %596 = vmatpush.msrb.mxu0 %v904_v22 }
 0x131   :  { %597 = vmatmul.f32.vlgmr.msrb.gmra.mxu0 %v578_v29 }
 0x195   :  { %v442_v7 = vpop.f32.mrf.mxu3 }
 0x196   :  { %v443_v46 = vadd.f32 %v442_v7, %v1197_v4 }
 0x198   :  { %v445_v47 = vadd.f32 %v443_v46, %v1171_v28 }
 0x19a   :  { %447 = vst [vmem:[#allocation7 + $0x20] sm:$0xff] %v445_v47 }
 0x19d   :  { %v500_v52 = vpop.f32.mrf.mxu3 }
 0x19e   :  { %519 = vmatmul.f32.vlgmr.msrb.gmra.mxu1 %v500_v52 }
 0x1a5   :  { %v676_v57 = vpop.f32.mrf.mxu2 }
 0x1a6   :  { %v677_v58 = vadd.f32 %v676_v57, %v1197_v4 }
 0x1a8   :  { %v679_v28 = vadd.f32 %v677_v58, %v1189_v48 }
 0x1aa   :  { %681 = vst [vmem:[#allocation7 + $0x38] sm:$0xff] %v679_v28 }
 0x1ae   :  { %v598_v54 = vpop.f32.mrf.mxu0 }
 0x1af   :  { %v599_v55 = vadd.f32 %v598_v54, %v1197_v4 }
 0x1b1   :  { %v601_v56 = vadd.f32 %v599_v55, %v1184_v27 }
 0x1b3   :  { %603 = vst [vmem:[#allocation7 + $0x30] sm:$0xff] %v601_v56 }
 0x21b   :  { %v520_v59 = vpop.f32.mrf.mxu1 }
 0x21c   :  { %v521_v6 = vadd.f32 %v520_v59, %v1197_v4 }
 0x21e   :  { %v523_v60 = vadd.f32 %v521_v6, %v1194_v50 }
 0x220   :  { %525 = vst [vmem:[#allocation7 + $0x28] sm:$0xff] %v523_v60 }
 0x221   :  { %694 = dma.vmem_to_hbm [thread:$0]  %s687_s30, 1024, %s689_s7, [#allocation4], %s1110_s23, %s1110_s23, %s1111_s24  }
 0x222   :  { %1107 = dma.done.wait [#allocation4], 1024  }
 0x223   :  { %1108 = vsyncadd [#allocation4], 4294966272 }
 0x224   :  { %699 = vsyncpa [#allocation3], 1 }
 0x225   :  { %700 = vsyncpa [#allocation6], 1 }
 0x226   :  { %701 = vsyncpa [#allocation4], 1 }

</bundles_post_ra>
